<compile_context>
chip_gen: v5e
topology: v5e:2x2
jax: 0.10.0
libtpu: 0.0.40
codegen_flags: <defaults>
</compile_context>

<pallas_src>
import functools

import jax
import jax.numpy as jnp
from jax.experimental import pallas as pl
from jax.experimental.pallas import tpu as pltpu


# ----------------------------------------------------------------------------
# Kernels
# ----------------------------------------------------------------------------

def _dice_stream_kernel(p_ref, m_ref, inter_ref, union_ref):
    """One (1, S_blk, L) block of a single non-background (batch, ch) slab."""

    @pl.when(pl.program_id(1) == 0)
    def _():
        inter_ref[...] = jnp.zeros_like(inter_ref)
        union_ref[...] = jnp.zeros_like(union_ref)

    p = p_ref[...].astype(jnp.float32)            # (1, S_blk, L)
    m = m_ref[...].astype(jnp.float32)

    # Sublane-only reductions (VPU); cross-lane reduce deferred to the wrapper.
    inter_ref[...] += jnp.sum(p * m, axis=1, keepdims=True)   # (1, 1, L)
    union_ref[...] += jnp.sum(p + m, axis=1, keepdims=True)   # (1, 1, L)


def _dice_packed_kernel(p_ref, m_ref, inter_ref, union_ref, *,
                        rows_per_block, num_channels):
    """(R, S, L) block packing R consecutive (batch, ch) rows; ch-0 rows masked."""
    step = pl.program_id(0)

    @pl.when(step == 0)
    def _():
        inter_ref[...] = jnp.zeros_like(inter_ref)
        union_ref[...] = jnp.zeros_like(union_ref)

    p = p_ref[...].astype(jnp.float32)            # (R, S, L)
    m = m_ref[...].astype(jnp.float32)

    # Zero out channel-0 rows (global row index divisible by num_channels).
    row = step * rows_per_block + jax.lax.broadcasted_iota(jnp.int32, p.shape, 0)
    keep = (row % num_channels != 0).astype(jnp.float32)
    p = p * keep
    m = m * keep

    inter_ref[...] += jnp.sum(
        jnp.sum(p * m, axis=1, keepdims=True), axis=0, keepdims=True)  # (1,1,L)
    union_ref[...] += jnp.sum(
        jnp.sum(p + m, axis=1, keepdims=True), axis=0, keepdims=True)


# ----------------------------------------------------------------------------
# Tiling selection helpers
# ----------------------------------------------------------------------------

_PACK_BELOW_BYTES = 1 << 20          # per-slab size below which rows are packed
_PACKED_TARGET_BYTES = 1 << 20       # f32 working-set target for packed blocks
_VMEM_DEFAULT_SAFE_BYTES = 14 << 20  # keep under v5e's 16 MiB default scoped VMEM
_VMEM_RAISE_CAP_BYTES = 48 << 20     # keep under v7x's 64 MiB physical VMEM/TC


def _default_target_block_bytes():
    # ~2 MiB reaches ~85% of HBM roofline on every generation and keeps the
    # 2-input x 2-buffer footprint at 8 MiB (fits v5e's 16 MiB default scoped
    # VMEM).  v6e / v7x default to 32 MiB scoped VMEM, so 4 MiB blocks fit
    # comfortably and shave per-grid-step overhead a bit more.
    try:
        kind = jax.devices()[0].device_kind.lower()
    except Exception:
        return 2 << 20
    if "v6" in kind or "v7" in kind:
        return 4 << 20
    return 2 << 20


def _divisors(n):
    divs = set()
    d = 1
    while d * d <= n:
        if n % d == 0:
            divs.add(d)
            divs.add(n // d)
        d += 1
    return sorted(divs)


def _choose_stream_tiling(n, itemsize, target_bytes):
    """Pick (L, S_blk, block_bytes) for lane-dense (1, S_blk, L) blocks, n == S*L.

    L is a multiple of 128 whenever n has such a divisor; S_blk is a
    multiple-of-8 divisor of S (or S itself, which is always legal).  Prefers
    the largest block that stays under `target_bytes` (larger L on ties); if
    no legal tiling fits, returns the smallest legal block and lets the caller
    decide whether to raise the scoped-VMEM limit or bail out.
    """
    lane_divs = [d for d in _divisors(n) if d % 128 == 0] or [n]
    best = None       # largest legal block with bytes <= target
    smallest = None   # smallest legal block overall (fallback)
    for lane in sorted(lane_divs, reverse=True):
        s = n // lane
        for s_blk in set(d for d in _divisors(s) if d % 8 == 0) | {s}:
            b = s_blk * lane * itemsize
            if b <= target_bytes and (best is None or b > best[0]):
                best = (b, lane, s_blk)
            if smallest is None or b < smallest[0]:
                smallest = (b, lane, s_blk)
    b, lane, s_blk = best if best is not None else smallest
    return lane, s_blk, b


# ----------------------------------------------------------------------------
# pallas_call wrappers
# ----------------------------------------------------------------------------

def _dice_packed_call(pred_mask, mask, B, C, N):
    """Small-slab path: pack many (batch, channel) rows per block."""
    lane_divs = [d for d in _divisors(N) if d % 128 == 0]
    L = max(lane_divs) if lane_divs else N
    S = N // L
    rows = B * C
    # The kernel expands to f32 in VMEM, so size R by the f32 working set.
    r_cap = max(1, _PACKED_TARGET_BYTES // (4 * N))
    R = max(d for d in _divisors(rows) if d <= r_cap)
    num_blocks = rows // R

    # Free, contiguous reshapes (metadata only).
    p3 = pred_mask.reshape(rows, S, L)
    m3 = mask.reshape(rows, S, L)

    in_spec = pl.BlockSpec((R, S, L), lambda i: (i, 0, 0))
    out_spec = pl.BlockSpec((1, 1, L), lambda i: (0, 0, 0))
    kernel = functools.partial(
        _dice_packed_kernel, rows_per_block=R, num_channels=C)

    return pl.pallas_call(
        kernel,
        out_shape=(
            jax.ShapeDtypeStruct((1, 1, L), jnp.float32),
            jax.ShapeDtypeStruct((1, 1, L), jnp.float32),
        ),
        grid_spec=pltpu.PrefetchScalarGridSpec(
            num_scalar_prefetch=0,
            grid=(num_blocks,),
            in_specs=[in_spec, in_spec],
            out_specs=(out_spec, out_spec),
        ),
        compiler_params=pltpu.CompilerParams(
            dimension_semantics=("arbitrary",),
        ),
    )(p3, m3)


def _dice_stream_call(pred_mask, mask, B, C, N, itemsize, target_block_bytes):
    """Large-slab path: per-slab streaming, channel 0 skipped via index_map."""
    L, S_blk, block_bytes = _choose_stream_tiling(N, itemsize, target_block_bytes)
    S = N // L
    n_sub = S // S_blk

    vmem_limit_bytes = None
    if block_bytes > target_block_bytes:
        # Degenerate shape: no lane-dense tiling fits the budget (e.g.
        # H*W = 128 * large_prime).  2 inputs x 2 pipeline buffers of the
        # smallest legal block, plus headroom:
        needed = 4 * block_bytes + (2 << 20)
        if needed > _VMEM_RAISE_CAP_BYTES:
            return None                       # caller falls back to plain XLA
        if needed > _VMEM_DEFAULT_SAFE_BYTES:
            vmem_limit_bytes = needed

    num_slabs = B * (C - 1)                   # non-background (batch, ch) slabs
    total_steps = num_slabs * n_sub
    # Use both TensorCores (v7x megacore) whenever the flattened step count is
    # even -- this covers odd B*(C-1) (e.g. C == 2) as long as n_sub is even.
    num_shards = 2 if total_steps % 2 == 0 else 1
    steps_per_shard = total_steps // num_shards

    # Free, contiguous reshapes (metadata only, no extra HBM traffic).
    p3 = pred_mask.reshape(B * C, S, L)
    m3 = mask.reshape(B * C, S, L)

    def in_index_map(i, j):
        t = i * steps_per_shard + j
        slab = t // n_sub
        sub = t % n_sub
        # Skip channel 0 of every batch item purely via the index map
        # (no slicing, no wasted HBM bytes).
        row = (slab // (C - 1)) * C + 1 + slab % (C - 1)
        return (row, sub, 0)

    def out_index_map(i, j):
        return (i, 0, 0)                      # per-shard resident accumulator

    in_spec = pl.BlockSpec((1, S_blk, L), in_index_map)
    out_spec = pl.BlockSpec((1, 1, L), out_index_map)

    return pl.pallas_call(
        _dice_stream_kernel,
        out_shape=(
            jax.ShapeDtypeStruct((num_shards, 1, L), jnp.float32),
            jax.ShapeDtypeStruct((num_shards, 1, L), jnp.float32),
        ),
        grid_spec=pltpu.PrefetchScalarGridSpec(
            num_scalar_prefetch=0,
            grid=(num_shards, steps_per_shard),
            in_specs=[in_spec, in_spec],
            out_specs=(out_spec, out_spec),
        ),
        compiler_params=pltpu.CompilerParams(
            dimension_semantics=("parallel", "arbitrary"),
            vmem_limit_bytes=vmem_limit_bytes,
        ),
    )(p3, m3)


# ----------------------------------------------------------------------------
# Public API
# ----------------------------------------------------------------------------

def lane_dice_loss(pred_mask, mask, *, target_block_bytes=None,
                   min_stream_bytes=None):
    """Pallas implementation of LaneDICELoss.forward (num_cls implicit in C)."""
    assert pred_mask.shape == mask.shape
    B, C, H, W = pred_mask.shape
    assert C >= 2, "need at least one non-background channel"

    N = H * W
    itemsize = max(pred_mask.dtype.itemsize, mask.dtype.itemsize)
    if target_block_bytes is None:
        target_block_bytes = _default_target_block_bytes()
    if min_stream_bytes is None:
        min_stream_bytes = _PACK_BELOW_BYTES

    if N * itemsize < min_stream_bytes:
        inter_part, union_part = _dice_packed_call(pred_mask, mask, B, C, N)
    else:
        result = _dice_stream_call(
            pred_mask, mask, B, C, N, itemsize, target_block_bytes)
        if result is None:
            # Block would not fit on-chip even with a raised VMEM limit.
            return lane_dice_loss_ref(pred_mask, mask)
        inter_part, union_part = result

    # Tiny final combine in plain JAX (a few KB): cross-lane reduce + dice.
    intersection = jnp.sum(inter_part)
    union = jnp.sum(union_part)
    # Matches the PyTorch reference: union == 0 yields inf/nan (no epsilon).
    return 1.0 - 2.0 * intersection / union


def lane_dice_loss_ref(pred_mask, mask):
    p = pred_mask.astype(jnp.float32)
    m = mask.astype(jnp.float32)
    inter = jnp.sum(p[:, 1:, :, :] * m[:, 1:, :, :])
    union = jnp.sum(p[:, 1:, :, :]) + jnp.sum(m[:, 1:, :, :])
    return 1.0 - 2.0 * inter / union


if __name__ == "__main__":
    key = jax.random.PRNGKey(0)
    kp, km, kp2 = jax.random.split(key, 3)

    # Test 1: f32 inputs, num_cls=5 (module default), small spatial -> exercises
    # the packed small-slab path.
    B, C, H, W = 2, 5, 16, 16
    logits = jax.random.normal(kp, (B, C, H, W), dtype=jnp.float32)
    pred_mask = jax.nn.softmax(logits, axis=1)
    labels = jax.random.randint(km, (B, H, W), 0, C)
    mask = jax.nn.one_hot(labels, C, axis=1, dtype=jnp.float32)

    loss = jax.block_until_ready(lane_dice_loss(pred_mask, mask))
    ref = lane_dice_loss_ref(pred_mask, mask)
    assert jnp.allclose(loss, ref, rtol=1e-5, atol=1e-5), (loss, ref)

    # Test 2: bf16 inputs (half the HBM bytes; kernel accumulates in f32).
    pred_bf16 = pred_mask.astype(jnp.bfloat16)
    mask_bf16 = mask.astype(jnp.bfloat16)
    loss2 = jax.block_until_ready(lane_dice_loss(pred_bf16, mask_bf16))
    ref2 = lane_dice_loss_ref(pred_bf16, mask_bf16)
    assert jnp.allclose(loss2, ref2, rtol=1e-4, atol=1e-4), (loss2, ref2)

    # Test 3: force the streaming path with a tiny block budget so the
    # index-map channel skip, accumulator init/accumulate across grid steps,
    # and the 2-shard split are all exercised at small shapes.
    B3, C3, H3, W3 = 2, 3, 32, 32
    logits3 = jax.random.normal(kp2, (B3, C3, H3, W3), dtype=jnp.float32)
    pred3 = jax.nn.softmax(logits3, axis=1)
    labels3 = jax.random.randint(km, (B3, H3, W3), 0, C3)
    mask3 = jax.nn.one_hot(labels3, C3, axis=1, dtype=jnp.float32)
    loss3 = jax.block_until_ready(
        lane_dice_loss(pred3, mask3, target_block_bytes=2048, min_stream_bytes=0))
    ref3 = lane_dice_loss_ref(pred3, mask3)
    assert jnp.allclose(loss3, ref3, rtol=1e-5, atol=1e-5), (loss3, ref3)

    print("KERNEL_OK")
</pallas_src>

<mosaic_0001>
module attributes {stable_mosaic.version = 11 : i64} {
  func.func @_dice_packed_kernel(%arg0: i32, %arg1: memref<10x1x256xf32, #tpu.memory_space<vmem>>, %arg2: memref<10x1x256xf32, #tpu.memory_space<vmem>>, %arg3: memref<1x1x256xf32, #tpu.memory_space<vmem>>, %arg4: memref<1x1x256xf32, #tpu.memory_space<vmem>>) attributes {dimension_semantics = [#tpu.dimension_semantics<arbitrary>], iteration_bounds = array<i64: 1>, scalar_prefetch = 0 : i64, scratch_operands = 0 : i64, tpu.core_type = #tpu.core_type<tc>, window_params = [{transform_indices = @transform_0, window_bounds = array<i64: 10, 1, 256>}, {transform_indices = @transform_1, window_bounds = array<i64: 10, 1, 256>}, {pipeline_mode = #tpu.pipeline_mode<synchronous>, transform_indices = @transform_2, window_bounds = array<i64: 1, 1, 256>}, {pipeline_mode = #tpu.pipeline_mode<synchronous>, transform_indices = @transform_3, window_bounds = array<i64: 1, 1, 256>}]} {
    %c0_i32 = arith.constant 0 : i32
    %0 = arith.cmpi eq, %arg0, %c0_i32 : i32
    %1 = arith.extui %0 : i1 to i32
    %c0_i32_0 = arith.constant 0 : i32
    %2 = arith.cmpi ne, %1, %c0_i32_0 : i32
    scf.if %2 {
      %cst_26 = arith.constant 0.000000e+00 : f32
      %47 = vector.broadcast %cst_26 : f32 to vector<1x1x256xf32>
      %c0_27 = arith.constant 0 : index
      %c0_28 = arith.constant 0 : index
      %c0_29 = arith.constant 0 : index
      %48 = vector.load %arg3[%c0_27, %c0_28, %c0_29] : memref<1x1x256xf32, #tpu.memory_space<vmem>>, vector<1x1x256xf32>
      tpu.vector_store %arg3[%c0_27, %c0_28, %c0_29], %47 {strides = array<i32>} : memref<1x1x256xf32, #tpu.memory_space<vmem>>, vector<1x1x256xf32>,
      %cst_30 = arith.constant 0.000000e+00 : f32
      %49 = vector.broadcast %cst_30 : f32 to vector<1x1x256xf32>
      %c0_31 = arith.constant 0 : index
      %c0_32 = arith.constant 0 : index
      %c0_33 = arith.constant 0 : index
      %50 = vector.load %arg4[%c0_31, %c0_32, %c0_33] : memref<1x1x256xf32, #tpu.memory_space<vmem>>, vector<1x1x256xf32>
      tpu.vector_store %arg4[%c0_31, %c0_32, %c0_33], %49 {strides = array<i32>} : memref<1x1x256xf32, #tpu.memory_space<vmem>>, vector<1x1x256xf32>,
    } else {
    }
    %c0 = arith.constant 0 : index
    %c0_1 = arith.constant 0 : index
    %c0_2 = arith.constant 0 : index
    %3 = vector.load %arg1[%c0, %c0_1, %c0_2] : memref<10x1x256xf32, #tpu.memory_space<vmem>>, vector<10x1x256xf32>
    %c0_3 = arith.constant 0 : index
    %c0_4 = arith.constant 0 : index
    %c0_5 = arith.constant 0 : index
    %4 = vector.load %arg2[%c0_3, %c0_4, %c0_5] : memref<10x1x256xf32, #tpu.memory_space<vmem>>, vector<10x1x256xf32>
    %c10_i32 = arith.constant 10 : i32
    %5 = arith.muli %arg0, %c10_i32 : i32
    %6 = tpu.iota {dimensions = array<i32: 0>} : vector<10x1x256xi32>
    %7 = vector.broadcast %5 : i32 to vector<10x1x256xi32>
    %8 = arith.addi %7, %6 : vector<10x1x256xi32>
    %c5_i32 = arith.constant 5 : i32
    %c0_i32_6 = arith.constant 0 : i32
    %9 = arith.cmpi eq, %c5_i32, %c0_i32_6 : i32
    %c1_i32 = arith.constant 1 : i32
    %10 = arith.select %9, %c1_i32, %c5_i32 : i32
    %11 = vector.broadcast %10 : i32 to vector<10x1x256xi32>
    %12 = arith.remsi %8, %11 : vector<10x1x256xi32>
    %c0_i32_7 = arith.constant 0 : i32
    %13 = vector.broadcast %c0_i32_7 : i32 to vector<10x1x256xi32>
    %14 = arith.cmpi ne, %12, %13 : vector<10x1x256xi32>
    %c0_i32_8 = arith.constant 0 : i32
    %15 = vector.broadcast %c0_i32_8 : i32 to vector<10x1x256xi32>
    %16 = arith.cmpi slt, %12, %15 : vector<10x1x256xi32>
    %c0_i32_9 = arith.constant 0 : i32
    %17 = arith.cmpi slt, %10, %c0_i32_9 : i32
    %18 = vector.broadcast %17 : i1 to vector<10x1x256xi1>
    %19 = vector.broadcast %18 : vector<10x1x256xi1> to vector<10x1x256xi1>
    %20 = arith.xori %16, %19 : vector<10x1x256xi1>
    %21 = arith.andi %20, %14 : vector<10x1x256xi1>
    %22 = vector.broadcast %10 : i32 to vector<10x1x256xi32>
    %23 = arith.addi %12, %22 : vector<10x1x256xi32>
    %24 = arith.select %21, %23, %12 : vector<10x1x256xi1>, vector<10x1x256xi32>
    %c0_i32_10 = arith.constant 0 : i32
    %25 = vector.broadcast %c0_i32_10 : i32 to vector<10x1x256xi32>
    %26 = arith.cmpi ne, %24, %25 : vector<10x1x256xi32>
    %27 = arith.extui %26 : vector<10x1x256xi1> to vector<10x1x256xi32>
    %28 = arith.sitofp %27 : vector<10x1x256xi32> to vector<10x1x256xf32>
    %29 = arith.mulf %3, %28 : vector<10x1x256xf32>
    %30 = arith.mulf %4, %28 : vector<10x1x256xf32>
    %c0_11 = arith.constant 0 : index
    %c0_12 = arith.constant 0 : index
    %c0_13 = arith.constant 0 : index
    %31 = vector.load %arg3[%c0_11, %c0_12, %c0_13] : memref<1x1x256xf32, #tpu.memory_space<vmem>>, vector<1x1x256xf32>
    %32 = arith.mulf %29, %30 : vector<10x1x256xf32>
    %cst = arith.constant dense<0.000000e+00> : vector<10x256xf32>
    %33 = vector.multi_reduction <add>, %32, %cst [1] : vector<10x1x256xf32> to vector<10x256xf32>
    %34 = vector.shape_cast %33 : vector<10x256xf32> to vector<10x1x256xf32>
    %cst_14 = arith.constant dense<0.000000e+00> : vector<1x256xf32>
    %35 = vector.multi_reduction <add>, %34, %cst_14 [0] : vector<10x1x256xf32> to vector<1x256xf32>
    %36 = vector.shape_cast %35 : vector<1x256xf32> to vector<1x1x256xf32>
    %37 = arith.addf %31, %36 : vector<1x1x256xf32>
    %c0_15 = arith.constant 0 : index
    %c0_16 = arith.constant 0 : index
    %c0_17 = arith.constant 0 : index
    %38 = vector.load %arg3[%c0_15, %c0_16, %c0_17] : memref<1x1x256xf32, #tpu.memory_space<vmem>>, vector<1x1x256xf32>
    tpu.vector_store %arg3[%c0_15, %c0_16, %c0_17], %37 {strides = array<i32>} : memref<1x1x256xf32, #tpu.memory_space<vmem>>, vector<1x1x256xf32>,
    %c0_18 = arith.constant 0 : index
    %c0_19 = arith.constant 0 : index
    %c0_20 = arith.constant 0 : index
    %39 = vector.load %arg4[%c0_18, %c0_19, %c0_20] : memref<1x1x256xf32, #tpu.memory_space<vmem>>, vector<1x1x256xf32>
    %40 = arith.addf %29, %30 : vector<10x1x256xf32>
    %cst_21 = arith.constant dense<0.000000e+00> : vector<10x256xf32>
    %41 = vector.multi_reduction <add>, %40, %cst_21 [1] : vector<10x1x256xf32> to vector<10x256xf32>
    %42 = vector.shape_cast %41 : vector<10x256xf32> to vector<10x1x256xf32>
    %cst_22 = arith.constant dense<0.000000e+00> : vector<1x256xf32>
    %43 = vector.multi_reduction <add>, %42, %cst_22 [0] : vector<10x1x256xf32> to vector<1x256xf32>
    %44 = vector.shape_cast %43 : vector<1x256xf32> to vector<1x1x256xf32>
    %45 = arith.addf %39, %44 : vector<1x1x256xf32>
    %c0_23 = arith.constant 0 : index
    %c0_24 = arith.constant 0 : index
    %c0_25 = arith.constant 0 : index
    %46 = vector.load %arg4[%c0_23, %c0_24, %c0_25] : memref<1x1x256xf32, #tpu.memory_space<vmem>>, vector<1x1x256xf32>
    tpu.vector_store %arg4[%c0_23, %c0_24, %c0_25], %45 {strides = array<i32>} : memref<1x1x256xf32, #tpu.memory_space<vmem>>, vector<1x1x256xf32>,
    return
  }
  func.func @transform_0(%arg0: i32) -> (i32, i32, i32) {
    %c0_i32 = arith.constant 0 : i32
    %c0_i32_0 = arith.constant 0 : i32
    %c0_i32_1 = arith.constant 0 : i32
    return %arg0, %c0_i32, %c0_i32_0 : i32, i32, i32
  }
  func.func @transform_1(%arg0: i32) -> (i32, i32, i32) {
    %c0_i32 = arith.constant 0 : i32
    %c0_i32_0 = arith.constant 0 : i32
    %c0_i32_1 = arith.constant 0 : i32
    return %arg0, %c0_i32, %c0_i32_0 : i32, i32, i32
  }
  func.func @transform_2(%arg0: i32) -> (i32, i32, i32) {
    %c0_i32 = arith.constant 0 : i32
    %c0_i32_0 = arith.constant 0 : i32
    %c0_i32_1 = arith.constant 0 : i32
    %c0_i32_2 = arith.constant 0 : i32
    return %c0_i32, %c0_i32_0, %c0_i32_1 : i32, i32, i32
  }
  func.func @transform_3(%arg0: i32) -> (i32, i32, i32) {
    %c0_i32 = arith.constant 0 : i32
    %c0_i32_0 = arith.constant 0 : i32
    %c0_i32_1 = arith.constant 0 : i32
    %c0_i32_2 = arith.constant 0 : i32
    return %c0_i32, %c0_i32_0, %c0_i32_1 : i32, i32, i32
  }
}

</mosaic_0001>

<bundles_post_ra>
// kernel: tpu_custom_call.1
= control target key start
LH: loop header
LB: loop body
LE: loop exit
PB: predicated region body
PF: predicated region fallthrough
CT: control target
= control target key end

     0   :  { %9 = vsyncpa [#allocation3], 0  ;;  %s1216_s0 = inlined_call_operand.hbm [shape: f32[10,1,256], index: 0, kind: input, shape index: {}]   ;;  %s1217_s1 = inlined_call_operand.hbm [shape: f32[10,1,256], index: 1, kind: input, shape index: {}]   ;;  %s1218_s2 = inlined_call_operand.hbm [shape: f32[1,1,256], index: 2, kind: output, shape index: {0}]   ;;  %s1219_s3 = inlined_call_operand.hbm [shape: f32[1,1,256], index: 3, kind: output, shape index: {1}]  }
   0x1   :  { %10 = vsyncpa [#allocation6], 0 }
   0x2   :  { %11 = vsyncpa [#allocation4], 0 }
   0x3   :  { %12 = vsyncpa [#allocation9], 0  ;;  %s17_s14 = sshll.u32 %s1216_s0, 4  ;;  %s879_s15 = smov [#allocation2]   ;;  %s18_s14 = int_to_ptr.hbm [resolvable:$true] %s17_s14 }
   0x4   :  { %s19_s16 = sshll.u32 %s879_s15, 4  ;;  %s30_s19 = sshll.u32 %s1217_s1, 4  ;;  %s20_s16 = int_to_ptr.vmem [resolvable:$true] %s19_s16  ;;  %s31_s19 = int_to_ptr.hbm [resolvable:$true] %s30_s19 }
   0x5   :  { %s880_s20 = smov 32   ;;  %s881_s21 = smov 2  }
   0x6   :  { %25 = dma.hbm_to_vmem [thread:$0]  %s18_s14, 320, %s20_s16, [#allocation3], %s880_s20, %s880_s20, %s881_s21  }
   0x7   :  { %s882_s22 = smov [#allocation5]  }
   0x8   :  { %s32_s23 = sshll.u32 %s882_s22, 4  ;;  %s33_s23 = int_to_ptr.vmem [resolvable:$true] %s32_s23 }
   0x9   :  { %38 = dma.hbm_to_vmem [thread:$0]  %s31_s19, 320, %s33_s23, [#allocation6], %s880_s20, %s880_s20, %s881_s21  }
   0xa   :  { %871 = dma.done.wait [#allocation3], 320  }
   0xb   :  { %872 = vsyncadd [#allocation3], 4294966976 }
   0xc   :  { %873 = dma.done.wait [#allocation6], 320  }
   0xd   :  { %874 = vsyncadd [#allocation6], 4294966976  ;;  %v51_v0 = vlaneseq  ;;  %v1222_v1 = vmov 0  ;;  %v883_v2 = vmov 52429   ;;  %v884_v3 = vmov 104858   ;;  %s894_s0 = smov [#allocation7]  }
   0xe   :  { %vm131_vm1 = vc.u32 %v883_v2, 3435921408  ;;  %vm160_vm2 = vc.u32 %v884_v3, 2576875520  ;;  %v885_v4 = vmov 157287   ;;  %v886_v5 = vmov 0.0   ;;  %v74_v58 = vld [vmem:[#allocation5 + $0xe] sm:$0x3] }
   0xf   :  { %vm922_vm0 = vcmp.lt.s32.totalorder %v51_v0, 256  ;;  %vm189_vm3 = vc.u32 %v885_v4, 1717829632  ;;  %v887_v6 = vmov 0   ;;  %v888_v9 = vmov 209716   ;;  %s720_s1 = sshll.u32 %s894_s0, 4  ;;  %s722_s26 = sshll.u32 %s1218_s2, 4  ;;  %s721_s1 = int_to_ptr.vmem [resolvable:$true] %s720_s1  ;;  %s723_s26 = int_to_ptr.hbm [resolvable:$true] %s722_s26 }
  0x10   :  { %v1223_v1 = vsel %vm922_vm0, 4294967295, %v1222_v1  ;;  %55 = vst.msk [vmem:[#allocation7] sm:$0x3] %vm922_vm0, %v886_v5  ;;  %v161_v7 = vsel %vm160_vm2, 1, %v887_v6  ;;  %v190_v8 = vsel %vm189_vm3, 1, %v887_v6  ;;  %vm218_vm4 = vc.u32 %v888_v9, 858783744 }
  0x11   :  { %56 = vst.msk [vmem:[#allocation8] sm:$0x3] %vm922_vm0, %v886_v5  ;;  %v132_v10 = vsel %vm131_vm1, 1, %v887_v6  ;;  %v168_v11 = vadd.s32 1, %v161_v7  ;;  %v197_v12 = vadd.s32 2, %v190_v8  ;;  %v219_v13 = vsel %vm218_vm4, 1, %v887_v6 }
  0x12   :  { %v141_v14 = vshrl.u32 %v132_v10, 2  ;;  %v889_v15 = vmov 262145   ;;  %v226_v17 = vadd.s32 3, %v219_v13  ;;  %v890_v20 = vmov 314574   ;;  %s895_s2 = smov [#allocation8]   ;;  %s733_s30 = sshll.u32 %s1219_s3, 4  ;;  %s734_s30 = int_to_ptr.hbm [resolvable:$true] %s733_s30 }
  0x13   :  { %vm247_vm5 = vc.u32 %v889_v15, 4294705152  ;;  %v170_v16 = vshrl.u32 %v168_v11, 2  ;;  %v199_v18 = vshrl.u32 %v197_v12, 2  ;;  %vm276_vm6 = vc.u32 %v890_v20, 3435659264  ;;  %v57_v20 = vld [vmem:[#allocation2] sm:$0x3] }
  0x14   :  { %v248_v19 = vsel %vm247_vm5, 1, %v887_v6  ;;  %v142_v21 = vmul.u32 5, %v141_v14  ;;  %v228_v23 = vshrl.u32 %v226_v17, 2  ;;  %v277_v25 = vsel %vm276_vm6, 1, %v887_v6  ;;  %s731_s27 = sshll.u32 %s895_s2, 4  ;;  %s732_s27 = int_to_ptr.vmem [resolvable:$true] %s731_s27 }
  0x15   :  { %v171_v22 = vmul.u32 5, %v170_v16  ;;  %v255_v24 = vadd.s32 3, %v248_v19  ;;  %v200_v26 = vmul.u32 5, %v199_v18  ;;  %v284_v27 = vadd.s32 4, %v277_v25 }
  0x16   :  { %v932_v28 = vsub.s32 1, %v142_v21  ;;  %v229_v29 = vmul.u32 5, %v228_v23  ;;  %v891_v31 = vmov 367003   ;;  %v892_v34 = vmov 419432   ;;  %v58_v21 = vld [vmem:[#allocation2 + $0x2] sm:$0x3] }
  0x17   :  { %v257_v30 = vshrl.u32 %v255_v24, 2  ;;  %vm305_vm7 = vc.u32 %v891_v31, 2576613376  ;;  %v286_v32 = vshrl.u32 %v284_v27, 2  ;;  %vm334_vm8 = vc.u32 %v892_v34, 1717567488  ;;  %v59_v24 = vld [vmem:[#allocation2 + $0x4] sm:$0x3] }
  0x18   :  { %v306_v33 = vsel %vm305_vm7, 1, %v887_v6  ;;  %v934_v35 = vsub.s32 2, %v171_v22  ;;  %v335_v38 = vsel %vm334_vm8, 1, %v887_v6  ;;  %v936_v39 = vsub.s32 3, %v200_v26  ;;  %v61_v34 = vld [vmem:[#allocation2 + $0x8] sm:$0x3] }
  0x19   :  { %v258_v36 = vmul.u32 5, %v257_v30  ;;  %v313_v37 = vadd.s32 5, %v306_v33  ;;  %v287_v40 = vmul.u32 5, %v286_v32  ;;  %v342_v41 = vadd.s32 6, %v335_v38  ;;  %v67_v30 = vld [vmem:[#allocation5] sm:$0x3] }
  0x1a   :  { %v893_v42 = vmov 471861   ;;  %v938_v43 = vsub.s32 4, %v229_v29  ;;  %vm379_vm10 = vcmp.ne.s32.totalorder %v932_v28, 0  ;;  %vm380_vm11 = vcmp.ne.s32.totalorder %v934_v35, 0  ;;  %v60_v29 = vld [vmem:[#allocation2 + $0x6] sm:$0x3] }
  0x1b   :  { %vm363_vm9 = vc.u32 %v893_v42, 858521600  ;;  %v315_v44 = vshrl.u32 %v313_v37, 2  ;;  %v940_v46 = vsub.s32 5, %v258_v36  ;;  %v344_v47 = vshrl.u32 %v342_v41, 2  ;;  %v63_v36 = vld [vmem:[#allocation2 + $0xc] sm:$0x3] }
  0x1c   :  { %v364_v45 = vsel %vm363_vm9, 1, %v887_v6  ;;  %v288_v49 = vsub.s32 6, %v287_v40  ;;  %vm389_vm12 = vcmp.lt.s32.totalorder %v932_v28, 0  ;;  %vm381_vm13 = vcmp.ne.s32.totalorder %v936_v39, 0  ;;  %v68_v37 = vld [vmem:[#allocation5 + $0x2] sm:$0x3] }
  0x1d   :  { %v371_v48 = vadd.s32 7, %v364_v45  ;;  %v316_v50 = vmul.u32 5, %v315_v44  ;;  %v345_v51 = vmul.u32 5, %v344_v47  ;;  %vm390_vm14 = vcmp.lt.s32.totalorder %v934_v35, 0  ;;  %vm950_vm3 = vmand %vm389_vm12, %vm379_vm10  ;;  %v69_v38 = vld [vmem:[#allocation5 + $0x4] sm:$0x3] }
  0x1e   :  { %vm382_vm15 = vcmp.ne.s32.totalorder %v938_v43, 0  ;;  %vm391_vm1 = vcmp.lt.s32.totalorder %v936_v39, 0  ;;  %vm392_vm2 = vcmp.lt.s32.totalorder %v938_v43, 0  ;;  %vm393_vm5 = vcmp.lt.s32.totalorder %v940_v46, 0  ;;  %vm958_vm6 = vmand %vm390_vm14, %vm380_vm11  ;;  %v64_v41 = vld [vmem:[#allocation2 + $0xe] sm:$0x3] }
  0x1f   :  { %v373_v52 = vshrl.u32 %v371_v48, 2  ;;  %v317_v53 = vsub.s32 7, %v316_v50  ;;  %v346_v55 = vsub.s32 8, %v345_v51  ;;  %vm384_vm7 = vcmp.ne.s32.totalorder %v288_v49, 0  ;;  %vm964_vm10 = vmand %vm391_vm1, %vm381_vm13  ;;  %v70_v42 = vld [vmem:[#allocation5 + $0x6] sm:$0x3] }
  0x20   :  { %vm394_vm9 = vcmp.lt.s32.totalorder %v288_v49, 0  ;;  %v409_v59 = vadd.s32 5, %v932_v28  ;;  %vm971_vm4 = vmand %vm392_vm2, %vm382_vm15  ;;  %v1230_v61 = vmov 0  ;;  %v410_v62 = vadd.s32 5, %v934_v35  ;;  %v71_v47 = vld [vmem:[#allocation5 + $0x8] sm:$0x3] }
  0x21   :  { %v374_v56 = vmul.u32 5, %v373_v52  ;;  %vm395_vm12 = vcmp.lt.s32.totalorder %v317_v53, 0  ;;  %v1231_v61 = vsel %vm971_vm4, 4294967295, %v1230_v61  ;;  %v411_v63 = vadd.s32 5, %v936_v39  ;;  %vm987_vm8 = vmand %vm394_vm9, %vm384_vm7  ;;  %v72_v52 = vld [vmem:[#allocation5 + $0xa] sm:$0x3] }
  0x22   :  { %vm386_vm11 = vcmp.ne.s32.totalorder %v346_v55, 0  ;;  %vm396_vm14 = vcmp.lt.s32.totalorder %v346_v55, 0  ;;  %vm1232_vm13 = vcmp.ne.s32.totalorder %v940_v46, 0  ;;  %v412_v2 = vadd.s32 5, %v938_v43 }
  0x23   :  { %v375_v60 = vsub.s32 9, %v374_v56  ;;  %vm979_vm1 = vmand %vm393_vm5, %vm1232_vm13  ;;  %v413_v3 = vadd.s32 5, %v940_v46  ;;  %v414_v6 = vadd.s32 5, %v288_v49  ;;  %v415_v7 = vadd.s32 5, %v317_v53 }
  0x24   :  { %vm1237_vm0 = vcmp.ne.s32.totalorder %v317_v53, 0  ;;  %v416_v9 = vadd.s32 5, %v346_v55  ;;  %v419_v10 = vsel %vm950_vm3, %v409_v59, %v932_v28  ;;  %vm999_vm5 = vmand %vm396_vm14, %vm386_vm11  ;;  %v420_v13 = vsel %vm958_vm6, %v410_v62, %v934_v35  ;;  %v62_v35 = vld [vmem:[#allocation2 + $0xa] sm:$0x3]  ;;  %v65_v62 = vld [vmem:[#allocation2 + $0x10] sm:$0x3] }
  0x25   :  { %vm387_vm15 = vcmp.ne.s32.totalorder %v375_v60, 0  ;;  %vm397_vm2 = vcmp.lt.s32.totalorder %v375_v60, 0  ;;  %vm992_vm4 = vmand %vm395_vm12, %vm1237_vm0  ;;  %v417_v12 = vadd.s32 5, %v375_v60  ;;  %v421_v15 = vsel %vm964_vm10, %v411_v63, %v936_v39  ;;  %v75_v63 = vld [vmem:[#allocation5 + $0x10] sm:$0x3] }
  0x26   :  { %vm1006_vm7 = vmand %vm397_vm2, %vm387_vm15  ;;  %vm1244_vm0 = vnez %v1231_v61  ;;  %v423_v17 = vsel %vm979_vm1, %v413_v3, %v940_v46  ;;  %v424_v18 = vsel %vm987_vm8, %v414_v6, %v288_v49  ;;  %v425_v19 = vsel %vm992_vm4, %v415_v7, %v317_v53  ;;  %v73_v53 = vld [vmem:[#allocation5 + $0xc] sm:$0x3] }
  0x27   :  { %v422_v16 = vsel %vm1244_vm0, %v412_v2, %v938_v43  ;;  %vm429_vm3 = vcmp.ne.s32.totalorder %v419_v10, 0  ;;  %v426_v22 = vsel %vm999_vm5, %v416_v9, %v346_v55  ;;  %vm1025_vm6 = vcmp.ne.s32.totalorder %v420_v13, 0  ;;  %v76_v10 = vld [vmem:[#allocation5 + $0x12] sm:$0x3] }
  0x28   :  { %v427_v25 = vsel %vm1006_vm7, %v417_v12, %v375_v60  ;;  %vm1031_vm9 = vcmp.ne.s32.totalorder %v421_v15, 0  ;;  %vm1035_vm8 = vcmp.ne.s32.totalorder %v422_v16, 0  ;;  %vm1039_vm4 = vcmp.ne.s32.totalorder %v423_v17, 0 }
  0x29   :  { %vm1043_vm10 = vcmp.ne.s32.totalorder %v424_v18, 0  ;;  %vm1047_vm12 = vcmp.ne.s32.totalorder %v425_v19, 0  ;;  %v749_v33 = vsel %vm429_vm3, 1.0, %v886_v5  ;;  %vm1052_vm11 = vcmp.ne.s32.totalorder %v426_v22, 0 }
  0x2a   :  { %v750_v40 = vsel %vm1025_vm6, 1.0, %v886_v5  ;;  %vm1059_vm14 = vcmp.ne.s32.totalorder %v427_v25, 0  ;;  %v751_v44 = vsel %vm1031_vm9, 1.0, %v886_v5  ;;  %v752_v45 = vsel %vm1035_vm8, 1.0, %v886_v5 }
  0x2b   :  { %v753_v46 = vsel %vm1039_vm4, 1.0, %v886_v5  ;;  %v754_v48 = vsel %vm1043_vm10, 1.0, %v886_v5  ;;  %v755_v49 = vsel %vm1047_vm12, 1.0, %v886_v5  ;;  %v1078_v50 = vmul.f32 0.0, %v57_v20 }
  0x2c   :  { %v1080_v51 = vmul.f32 %v749_v33, %v58_v21  ;;  %v1082_v54 = vmul.f32 %v750_v40, %v59_v24  ;;  %v1084_v55 = vmul.f32 0.0, %v67_v30  ;;  %v1086_v56 = vmul.f32 %v749_v33, %v68_v37 }
  0x2d   :  { %v1088_v57 = vmul.f32 %v750_v40, %v69_v38  ;;  %v756_v59 = vsel %vm1052_vm11, 1.0, %v886_v5  ;;  %v757_v60 = vsel %vm1059_vm14, 1.0, %v886_v5  ;;  %v1096_v61 = vmul.f32 %v751_v44, %v60_v29  ;;  %v66_v5 = vld [vmem:[#allocation2 + $0x12] sm:$0x3] }
  0x2e   :  { %v1098_v0 = vmul.f32 %v752_v45, %v61_v34  ;;  %v1100_v2 = vmul.f32 %v753_v46, %v62_v35  ;;  %v1102_v3 = vmul.f32 %v754_v48, %v63_v36  ;;  %v1104_v4 = vmul.f32 %v751_v44, %v70_v42 }
  0x2f   :  { %v1106_v6 = vmul.f32 %v755_v49, %v64_v41  ;;  %v1108_v7 = vmul.f32 %v752_v45, %v71_v47  ;;  %v1110_v8 = vmul.f32 %v753_v46, %v72_v52  ;;  %v1112_v9 = vmul.f32 %v754_v48, %v73_v53 }
  0x30   :  { %v1114_v11 = vmul.f32 %v755_v49, %v74_v58  ;;  %v479_v12 = vmul.f32 %v1084_v55, %v1078_v50  ;;  %v480_v13 = vmul.f32 %v1086_v56, %v1080_v51  ;;  %v481_v14 = vmul.f32 %v1088_v57, %v1082_v54 }
  0x31   :  { %v1122_v15 = vmul.f32 %v756_v59, %v65_v62  ;;  %v1124_v16 = vmul.f32 %v756_v59, %v75_v63  ;;  %v482_v17 = vmul.f32 %v1104_v4, %v1096_v61  ;;  %v1128_v21 = vmul.f32 %v757_v60, %v66_v5 }
  0x32   :  { %v509_v18 = vperm.slane %v479_v12, 0  ;;  %v511_v19 = vperm.slane %v480_v13, 0  ;;  %v513_v20 = vperm.slane %v481_v14, 0  ;;  %v1130_v22 = vmul.f32 %v757_v60, %v76_v10 }
  0x33   :  { %v483_v23 = vmul.f32 %v1108_v7, %v1098_v0  ;;  %v484_v24 = vmul.f32 %v1110_v8, %v1100_v2  ;;  %v485_v25 = vmul.f32 %v1112_v9, %v1102_v3  ;;  %v486_v26 = vmul.f32 %v1114_v11, %v1106_v6 }
  0x34   :  { %v510_v27 = vperm.slane %v479_v12, 1  ;;  %v515_v28 = vperm.slane %v482_v17, 0  ;;  %v487_v29 = vmul.f32 %v1124_v16, %v1122_v15  ;;  %v512_v30 = vperm.slane %v480_v13, 1 }
  0x35   :  { %v514_v31 = vperm.slane %v481_v14, 1  ;;  %vm549_vm13 = vcmask 1040384   ;;  %v517_v32 = vperm.slane %v483_v23, 0  ;;  %v488_v36 = vmul.f32 %v1130_v22, %v1128_v21 }
  0x36   :  { %v550_v33 = vsel %vm549_vm13, %v509_v18, 0.0  ;;  %v551_v34 = vsel %vm549_vm13, %v511_v19, 0.0  ;;  %v553_v35 = vsel %vm549_vm13, %v513_v20, 0.0  ;;  %v516_v37 = vperm.slane %v482_v17, 1 }
  0x37   :  { %v518_v38 = vperm.slane %v483_v23, 1  ;;  %v552_v39 = vadd.f32 %v551_v34, %v550_v33  ;;  %v519_v40 = vperm.slane %v484_v24, 0  ;;  %v520_v41 = vperm.slane %v484_v24, 1 }
  0x38   :  { %v555_v42 = vsel %vm549_vm13, %v515_v28, 0.0  ;;  %v569_v43 = vsel %vm549_vm13, %v510_v27, 0.0  ;;  %v521_v44 = vperm.slane %v485_v25, 0  ;;  %v570_v46 = vsel %vm549_vm13, %v512_v30, 0.0 }
  0x39   :  { %v554_v45 = vadd.f32 %v553_v35, %v552_v39  ;;  %v572_v47 = vsel %vm549_vm13, %v514_v31, 0.0  ;;  %v522_v48 = vperm.slane %v485_v25, 1  ;;  %v523_v49 = vperm.slane %v486_v26, 0 }
  0x3a   :  { %v557_v52 = vsel %vm549_vm13, %v517_v32, 0.0  ;;  %v571_v53 = vadd.f32 %v570_v46, %v569_v43  ;;  %v524_v58 = vperm.slane %v486_v26, 1  ;;  %v525_v59 = vperm.slane %v487_v29, 0 }
  0x3b   :  { %v556_v60 = vadd.f32 %v555_v42, %v554_v45  ;;  %v574_v62 = vsel %vm549_vm13, %v516_v37, 0.0  ;;  %v526_v63 = vperm.slane %v487_v29, 1  ;;  %v527_v5 = vperm.slane %v488_v36, 0 }
  0x3c   :  { %v559_v10 = vsel %vm549_vm13, %v519_v40, 0.0  ;;  %v573_v12 = vadd.f32 %v572_v47, %v571_v53  ;;  %v528_v13 = vperm.slane %v488_v36, 1  ;;  %v576_v17 = vsel %vm549_vm13, %v518_v38, 0.0 }
  0x3d   :  { %v558_v14 = vadd.f32 %v557_v52, %v556_v60  ;;  %v600_v18 = vadd.f32 %v1084_v55, %v1078_v50  ;;  %v561_v19 = vsel %vm549_vm13, %v521_v44, 0.0  ;;  %v601_v23 = vadd.f32 %v1086_v56, %v1080_v51 }
  0x3e   :  { %v575_v20 = vadd.f32 %v574_v62, %v573_v12  ;;  %v602_v24 = vadd.f32 %v1088_v57, %v1082_v54  ;;  %v563_v26 = vsel %vm549_vm13, %v523_v49, 0.0  ;;  %v565_v27 = vsel %vm549_vm13, %v525_v59, 0.0 }
  0x3f   :  { %v560_v25 = vadd.f32 %v559_v10, %v558_v14  ;;  %v578_v28 = vsel %vm549_vm13, %v520_v41, 0.0  ;;  %v567_v29 = vsel %vm549_vm13, %v527_v5, 0.0  ;;  %v580_v50 = vsel %vm549_vm13, %v522_v48, 0.0  ;;  %v478_v14 = vld [vmem:[#allocation7] sm:$0x3] }
  0x40   :  { %v577_v30 = vadd.f32 %v576_v17, %v575_v20  ;;  %v603_v55 = vadd.f32 %v1104_v4, %v1096_v61  ;;  %v630_v51 = vperm.slane %v600_v18, 0  ;;  %v632_v56 = vperm.slane %v601_v23, 0 }
  0x41   :  { %v562_v31 = vadd.f32 %v561_v19, %v560_v25  ;;  %v634_v32 = vperm.slane %v602_v24, 0  ;;  %v582_v57 = vsel %vm549_vm13, %v524_v58, 0.0  ;;  %v584_v33 = vsel %vm549_vm13, %v526_v63, 0.0 }
  0x42   :  { %v579_v54 = vadd.f32 %v578_v28, %v577_v30  ;;  %v586_v34 = vsel %vm549_vm13, %v528_v13, 0.0  ;;  %v604_v36 = vadd.f32 %v1108_v7, %v1098_v0  ;;  %v605_v37 = vadd.f32 %v1110_v8, %v1100_v2 }
  0x43   :  { %v564_v35 = vadd.f32 %v563_v26, %v562_v31  ;;  %v636_v38 = vperm.slane %v603_v55, 0  ;;  %v631_v4 = vperm.slane %v600_v18, 1  ;;  %v633_v39 = vperm.slane %v601_v23, 1 }
  0x44   :  { %v581_v61 = vadd.f32 %v580_v50, %v579_v54  ;;  %v635_v40 = vperm.slane %v602_v24, 1  ;;  %v638_v41 = vperm.slane %v604_v36, 0  ;;  %v670_v42 = vsel %vm549_vm13, %v630_v51, 0.0 }
  0x45   :  { %v671_v43 = vsel %vm549_vm13, %v632_v56, 0.0  ;;  %v673_v44 = vsel %vm549_vm13, %v634_v32, 0.0  ;;  %v566_v45 = vadd.f32 %v565_v27, %v564_v35  ;;  %v606_v0 = vadd.f32 %v1112_v9, %v1102_v3 }
  0x46   :  { %v583_v46 = vadd.f32 %v582_v57, %v581_v61  ;;  %v672_v7 = vadd.f32 %v671_v43, %v670_v42  ;;  %v607_v2 = vadd.f32 %v1114_v11, %v1106_v6  ;;  %v637_v8 = vperm.slane %v603_v55, 1  ;;  %v599_v42 = vld [vmem:[#allocation8] sm:$0x3] }
  0x47   :  { %v640_v47 = vperm.slane %v605_v37, 0  ;;  %v675_v48 = vsel %vm549_vm13, %v636_v38, 0.0  ;;  %v639_v52 = vperm.slane %v604_v36, 1  ;;  %v642_v53 = vperm.slane %v606_v0, 0 }
  0x48   :  { %v585_v49 = vadd.f32 %v584_v33, %v583_v46  ;;  %v674_v58 = vadd.f32 %v673_v44, %v672_v7  ;;  %v677_v59 = vsel %vm549_vm13, %v638_v41, 0.0  ;;  %v689_v60 = vsel %vm549_vm13, %v631_v4, 0.0 }
  0x49   :  { %v690_v62 = vsel %vm549_vm13, %v633_v39, 0.0  ;;  %v692_v3 = vsel %vm549_vm13, %v635_v40, 0.0  ;;  %v568_v9 = vadd.f32 %v567_v29, %v566_v45  ;;  %v641_v11 = vperm.slane %v605_v37, 1 }
  0x4a   :  { %v587_v63 = vadd.f32 %v586_v34, %v585_v49  ;;  %v676_v5 = vadd.f32 %v675_v48, %v674_v58  ;;  %v691_v6 = vadd.f32 %v690_v62, %v689_v60  ;;  %v644_v10 = vperm.slane %v607_v2, 0 }
  0x4b   :  { %v679_v12 = vsel %vm549_vm13, %v640_v47, 0.0  ;;  %v694_v13 = vsel %vm549_vm13, %v637_v8, 0.0  ;;  %v608_v18 = vadd.f32 %v1124_v16, %v1122_v15  ;;  %v609_v23 = vadd.f32 %v1130_v22, %v1128_v21 }
  0x4c   :  { %v590_v17 = vrot.slane %v587_v63, 7  ;;  %v678_v19 = vadd.f32 %v677_v59, %v676_v5  ;;  %v693_v20 = vadd.f32 %v692_v3, %v691_v6  ;;  %v643_v24 = vperm.slane %v606_v0, 1 }
  0x4d   :  { %v681_v25 = vsel %vm549_vm13, %v642_v53, 0.0  ;;  %v696_v26 = vsel %vm549_vm13, %v639_v52, 0.0  ;;  %v645_v28 = vperm.slane %v607_v2, 1  ;;  %v646_v30 = vperm.slane %v608_v18, 0 }
  0x4e   :  { %v591_v27 = vsel %vm549_vm13, %v568_v9, %v590_v17  ;;  %v680_v15 = vadd.f32 %v679_v12, %v678_v19  ;;  %v695_v16 = vadd.f32 %v694_v13, %v693_v20  ;;  %v683_v50 = vsel %vm549_vm13, %v644_v10, 0.0 }
  0x4f   :  { %v593_v29 = vadd.f32 %v591_v27, %v478_v14  ;;  %v698_v55 = vsel %vm549_vm13, %v641_v11, 0.0  ;;  %vm1261_vm1 = vnez %v1223_v1  ;;  %v647_v22 = vperm.slane %v608_v18, 1 }
  0x50   :  { %v682_v31 = vadd.f32 %v681_v25, %v680_v15  ;;  %v697_v21 = vadd.f32 %v696_v26, %v695_v16  ;;  %v700_v51 = vsel %vm549_vm13, %v643_v24, 0.0  ;;  %v648_v54 = vperm.slane %v609_v23, 0 }
  0x51   :  { %598 = vst.msk [vmem:[#allocation7] sm:$0x3] %vm1261_vm1, %v593_v29  ;;  %v649_v57 = vperm.slane %v609_v23, 1  ;;  %v685_v33 = vsel %vm549_vm13, %v646_v30, 0.0  ;;  %v702_v34 = vsel %vm549_vm13, %v645_v28, 0.0  ;;  %v704_v36 = vsel %vm549_vm13, %v647_v22, 0.0 }
  0x52   :  { %v684_v56 = vadd.f32 %v683_v50, %v682_v31  ;;  %v699_v32 = vadd.f32 %v698_v55, %v697_v21  ;;  %725 = dma.vmem_to_hbm [thread:$0]  %s721_s1, 32, %s723_s26, [#allocation4]   ;;  %v687_v61 = vsel %vm549_vm13, %v648_v54, 0.0 }
  0x53   :  { %v706_v4 = vsel %vm549_vm13, %v649_v57, 0.0 }
  0x54   :  { %v701_v35 = vadd.f32 %v700_v51, %v699_v32  ;;  %v686_v37 = vadd.f32 %v685_v33, %v684_v56 }
  0x56   :  { %v703_v38 = vadd.f32 %v702_v34, %v701_v35  ;;  %v688_v40 = vadd.f32 %v687_v61, %v686_v37 }
  0x58   :  { %v705_v39 = vadd.f32 %v704_v36, %v703_v38 }
  0x5a   :  { %v707_v41 = vadd.f32 %v706_v4, %v705_v39 }
  0x5c   :  { %v710_v43 = vrot.slane %v707_v41, 7 }
  0x5e   :  { %v711_v44 = vsel %vm549_vm13, %v688_v40, %v710_v43 }
  0x5f   :  { %v713_v45 = vadd.f32 %v711_v44, %v599_v42 }
  0x61   :  { %714 = vst.msk [vmem:[#allocation8] sm:$0x3] %vm1261_vm1, %v713_v45 }
  0x62   :  { %736 = dma.vmem_to_hbm [thread:$0]  %s732_s27, 32, %s734_s30, [#allocation9]  }
  0x63   :  { %875 = dma.done.wait [#allocation4], 32  }
  0x64   :  { %876 = vsyncadd [#allocation4], 4294967264 }
  0x65   :  { %877 = dma.done.wait [#allocation9], 32  }
  0x66   :  { %878 = vsyncadd [#allocation9], 4294967264 }
  0x67   :  { %745 = vsyncpa [#allocation3], 1 }
  0x68   :  { %746 = vsyncpa [#allocation6], 1 }
  0x69   :  { %747 = vsyncpa [#allocation4], 1 }
  0x6a   :  { %748 = vsyncpa [#allocation9], 1 }

</bundles_post_ra>
